<compile_context>
chip_gen: v7x
topology: tpu7x:2x2x1
jax: 0.10.0
libtpu: 0.0.40
codegen_flags: <defaults>
</compile_context>

<pallas_src>
import numpy as np
import jax
import jax.numpy as jnp
from jax import lax
from jax.experimental import pallas as pl
from jax.experimental.pallas import tpu as pltpu

PI = 3.141592653589793
EPSILON = 2.0

_TEMPORAL = ('TTransE', 'TDistMult', 'TComplEx', 'TeRo')
_COMPLEX_LIKE = ('ComplEx', 'TComplEx', 'RotatE', 'TeRo')
_HAS_REG = ('DistMult', 'TDistMult')
_ALL_MODELS = ('TransE', 'TTransE', 'DistMult', 'TDistMult', 'ComplEx',
               'TComplEx', 'RotatE', 'TeRo')


def _round_up(a, m):
    return ((a + m - 1) // m) * m


def _cdiv(a, b):
    return -(-a // b)


def _vmem_capacity_bytes():
    try:
        info = pltpu.get_tpu_info()
        for attr in ('vmem_capacity_bytes', 'vmem_size_bytes', 'vmem_bytes'):
            v = getattr(info, attr, None)
            if v:
                return int(v)
    except Exception:
        pass
    return 64 * 1024 * 1024          # conservative fallback (v7x per-TC VMEM)


def _pad_idx(idx, n):
    idx = idx.astype(jnp.int32)
    return jnp.pad(idx, (0, n - idx.shape[0]))


# ---------------------------------------------------------------------------
# Score math on already-broadcast-compatible f32 operands (last axis = dim).
# Mirrors the torch model functions exactly (incl. head-batch parenthesis).
# ---------------------------------------------------------------------------
def _score_math(model_name, mode, gamma, emb_range, head, relation, tail,
                time, keepdims):
    def red(x):
        return jnp.sum(x, axis=-1, keepdims=keepdims)

    def halves(x):
        d = x.shape[-1] // 2
        return x[..., :d], x[..., d:]

    if model_name == 'TransE':
        s = head + (relation - tail) if mode == 'head-batch' else head + relation - tail
        return gamma - red(jnp.abs(s))

    if model_name == 'TTransE':
        s = (head + (relation + time - tail)) if mode == 'head-batch' \
            else head + relation + time - tail
        return gamma - red(jnp.abs(s))

    if model_name == 'DistMult':
        s = head * (relation * tail) if mode == 'head-batch' else head * relation * tail
        return red(s)

    if model_name == 'TDistMult':
        s = (head * (relation * tail) * time) if mode == 'head-batch' \
            else head * relation * tail * time
        return red(s)

    if model_name == 'ComplEx':
        re_h, im_h = halves(head)
        re_r, im_r = halves(relation)
        re_t, im_t = halves(tail)
        if mode == 'head-batch':
            re_s = re_r * re_t + im_r * im_t
            im_s = re_r * im_t - im_r * re_t
            s = re_h * re_s + im_h * im_s
        else:
            re_s = re_h * re_r - im_h * im_r
            im_s = re_h * im_r + im_h * re_r
            s = re_s * re_t + im_s * im_t
        return red(s)

    if model_name == 'TComplEx':
        re_h, im_h = halves(head)
        re_r, im_r = halves(relation)
        re_t, im_t = halves(tail)
        re_ti, im_ti = halves(time)
        if mode == 'head-batch':
            re_s = re_r * re_t * re_ti + im_r * im_t * re_ti
            im_s = re_r * im_t * im_ti - im_r * re_t * im_ti
            s = re_h * re_s + im_h * im_s
        else:
            re_s = re_h * re_r * re_ti - im_h * im_r * re_ti
            im_s = re_h * im_r * im_ti + im_h * re_r * im_ti
            s = re_s * re_t + im_s * im_t
        return red(s)

    if model_name == 'RotatE':
        re_h, im_h = halves(head)
        re_t, im_t = halves(tail)
        phase = relation / (emb_range / PI)
        re_r, im_r = jnp.cos(phase), jnp.sin(phase)
        if mode == 'head-batch':
            re_s = re_r * re_t + im_r * im_t
            im_s = re_r * im_t - im_r * re_t
            re_s, im_s = re_s - re_h, im_s - im_h
        else:
            re_s = re_h * re_r - im_h * im_r
            im_s = re_h * im_r + im_h * re_r
            re_s, im_s = re_s - re_t, im_s - im_t
        return gamma - red(jnp.sqrt(re_s * re_s + im_s * im_s))

    if model_name == 'TeRo':
        re_h, im_h = halves(head)
        re_t, im_t = halves(tail)
        re_ti, im_ti = halves(time)
        phase = relation / (emb_range / PI)
        re_r, im_r = jnp.cos(phase), jnp.sin(phase)
        if mode == 'head-batch':
            re_s = re_r * re_t * re_ti + im_r * im_t * im_ti
            im_s = re_r * im_t * im_ti - im_r * re_t * re_ti
            re_s, im_s = re_s - re_h, im_s - im_h
        else:
            re_s = re_h * re_ti * re_r - im_h * im_ti * im_r
            im_s = re_h * re_ti * im_r + im_h * im_ti * re_r
            re_s, im_s = re_s - re_t, im_s - im_t
        return gamma - red(jnp.sqrt(re_s * re_s + im_s * im_s))

    raise ValueError('model %s not supported' % model_name)


# ---------------------------------------------------------------------------
# Tile selection
# ---------------------------------------------------------------------------
def _clamp_tile(auto_tb, batch, cap, requested):
    tb = max(8, min(int(auto_tb), int(cap)))
    tb = (tb // 8) * 8
    if batch > 8:                              # >= 2 grid steps (feed both v7x TCs)
        tb = min(tb, _round_up(_cdiv(batch, 2), 8))
    tb = min(tb, _round_up(batch, 8))
    tb = max(8, tb)
    if requested is not None:                  # explicit tb is clamped to the budget
        tb = max(8, min((int(requested) // 8) * 8, tb))
    return tb


# ---------------------------------------------------------------------------
# Pallas kernel: single mode (all operands are [B_pad, D_i] rows).
# ---------------------------------------------------------------------------
def _fused_single_score(narrow, *, model_name, gamma, emb_range, tb, vmem_limit):
    names = [nm for nm, _ in narrow]
    arrays = [a for _, a in narrow]
    b_pad = arrays[0].shape[0]

    def kernel(*refs):
        in_refs = refs[:len(arrays)]
        out_ref = refs[len(arrays)]
        ops = {nm: r[...].astype(jnp.float32) for nm, r in zip(names, in_refs)}
        sc = _score_math(model_name, 'single', gamma, emb_range,
                         ops.get('head'), ops.get('relation'),
                         ops.get('tail'), ops.get('time'), keepdims=True)
        out_ref[...] = sc.astype(out_ref.dtype)

    return pl.pallas_call(
        kernel,
        out_shape=jax.ShapeDtypeStruct((b_pad, 1), jnp.float32),
        grid=(b_pad // tb,),
        in_specs=[pl.BlockSpec((tb, a.shape[1]), lambda i: (i, 0)) for a in arrays],
        out_specs=pl.BlockSpec((tb, 1), lambda i: (i, 0)),
        compiler_params=pltpu.CompilerParams(
            dimension_semantics=("parallel",),
            vmem_limit_bytes=vmem_limit),
    )(*arrays)


# ---------------------------------------------------------------------------
# Pallas kernel: batch modes with the negative-entity gather fused in-kernel.
# ---------------------------------------------------------------------------
def _fused_batch_score(narrow, wide_name, ent_table, neg_idx_flat, *, n_pad,
                       tn, model_name, mode, gamma, emb_range, want_wide_reg,
                       tb, vmem_limit):
    """narrow: list of (name, [B_pad, D_i]).  ent_table stays in HBM; the
    wide operand is gathered row-by-row via manual DMA, chunked over the
    negative axis with double-buffering.  Returns (score, |wide| or None)."""
    names = [nm for nm, _ in narrow]
    arrays = [a for _, a in narrow]
    n_narrow = len(arrays)
    b_pad = arrays[0].shape[0]
    d_ent = ent_table.shape[1]
    tbl_dtype = ent_table.dtype
    nn_chunks = n_pad // tn
    rows_per_chunk = tb * tn

    def kernel(idx_ref, *refs):
        nrefs = refs[:n_narrow]
        ent_hbm = refs[n_narrow]
        out_ref = refs[n_narrow + 1]
        reg_ref = refs[n_narrow + 2] if want_wide_reg else None
        buf = refs[-2]                       # VMEM [2, tb, tn, D] (table dtype)
        sem = refs[-1]                       # DMA sems [2]
        i = pl.program_id(0)

        # Narrow operands: load once per grid step, upcast, broadcast over N.
        ops = {nm: r[...].astype(jnp.float32)[:, None, :]
               for nm, r in zip(names, nrefs)}

        def issue(c, slot):
            # Gather entity rows for batch rows [i*tb, i*tb+tb) and negatives
            # [c*tn, (c+1)*tn) straight from HBM into the VMEM scratch slot.
            base = i * (tb * n_pad) + c * tn

            def body(k, carry):
                lb = k // tn
                ln = k - lb * tn
                row = idx_ref[base + lb * n_pad + ln]
                pltpu.make_async_copy(
                    ent_hbm.at[pl.ds(row, 1)],
                    buf.at[slot, lb, pl.ds(ln, 1)],
                    sem.at[slot]).start()
                return carry

            lax.fori_loop(0, rows_per_chunk, body, 0)

        def wait_all(slot):
            def body(k, carry):
                lb = k // tn
                ln = k - lb * tn
                pltpu.make_async_copy(
                    ent_hbm.at[pl.ds(0, 1)],
                    buf.at[slot, lb, pl.ds(ln, 1)],
                    sem.at[slot]).wait()
                return carry

            lax.fori_loop(0, rows_per_chunk, body, 0)

        issue(0, 0)
        for c in range(nn_chunks):           # static; nn_chunks is small
            slot = c % 2
            wait_all(slot)
            if c + 1 < nn_chunks:            # prefetch next chunk into other slot
                issue(c + 1, (c + 1) % 2)
            wide_raw = buf[slot]             # [tb, tn, D] in table dtype
            ops_c = dict(ops)
            ops_c[wide_name] = wide_raw.astype(jnp.float32)
            sc = _score_math(model_name, mode, gamma, emb_range,
                             ops_c.get('head'), ops_c.get('relation'),
                             ops_c.get('tail'), ops_c.get('time'),
                             keepdims=False)                  # [tb, tn]
            out_ref[:, c * tn:(c + 1) * tn] = sc.astype(out_ref.dtype)
            if want_wide_reg:
                # torch.sqrt(x**2) == |x|, written once from the resident tile
                reg_ref[:, c * tn:(c + 1) * tn, :] = (
                    jnp.abs(wide_raw).astype(reg_ref.dtype))

    in_specs = [pl.BlockSpec((tb, a.shape[1]), lambda i, idx: (i, 0))
                for a in arrays]
    in_specs.append(pl.BlockSpec(memory_space=pl.ANY))        # entity table (HBM)

    out_shapes = [jax.ShapeDtypeStruct((b_pad, n_pad), jnp.float32)]
    out_specs = [pl.BlockSpec((tb, n_pad), lambda i, idx: (i, 0))]
    if want_wide_reg:
        out_shapes.append(jax.ShapeDtypeStruct((b_pad, n_pad, d_ent), tbl_dtype))
        out_specs.append(
            pl.BlockSpec((tb, n_pad, d_ent), lambda i, idx: (i, 0, 0)))

    grid_spec = pltpu.PrefetchScalarGridSpec(
        num_scalar_prefetch=1,
        grid=(b_pad // tb,),
        in_specs=in_specs,
        out_specs=tuple(out_specs),
        scratch_shapes=[pltpu.VMEM((2, tb, tn, d_ent), tbl_dtype),
                        pltpu.SemaphoreType.DMA((2,))])

    results = pl.pallas_call(
        kernel,
        out_shape=tuple(out_shapes),
        grid_spec=grid_spec,
        compiler_params=pltpu.CompilerParams(
            dimension_semantics=("parallel",),
            vmem_limit_bytes=vmem_limit),
    )(neg_idx_flat, *arrays, ent_table)

    if want_wide_reg:
        return results[0], results[1]
    return results[0], None


# ---------------------------------------------------------------------------
# Full forward pass.
# ---------------------------------------------------------------------------
def kge_forward(sample, ent_emb, rel_emb, time_emb, *, model_name, gamma, dim,
                mode='single', tb=None):
    if model_name not in _ALL_MODELS:
        raise ValueError('model %s not supported' % model_name)
    emb_range = (gamma + EPSILON) / dim
    temporal = model_name in _TEMPORAL
    complexish = model_name in _COMPLEX_LIKE
    with_reg = model_name in _HAS_REG

    vmem = _vmem_capacity_bytes()
    budget = int(vmem * 2) // 5                     # ~40% of physical VMEM
    vmem_limit = max(32 * 1024 * 1024, (int(vmem) * 3) // 4)

    def gather(table, idx):
        return jnp.take(table, idx, axis=0)

    # ---------------- single mode ----------------
    if mode == 'single':
        b = int(sample.shape[0])
        specs = [('head', ent_emb, sample[:, 0]),
                 ('relation', rel_emb, sample[:, 1]),
                 ('tail', ent_emb, sample[:, 2])]
        if temporal:
            specs.append(('time', time_emb, sample[:, 3]))
        per_row = sum(2 * int(t.shape[1]) * t.dtype.itemsize
                      + 3 * int(t.shape[1]) * 4 for _, t, _i in specs) + 8
        tb_eff = _clamp_tile(budget // max(per_row, 1), b, 4096, tb)
        b_pad = _round_up(b, tb_eff)
        narrow = [(nm, gather(t, _pad_idx(idx, b_pad))) for nm, t, idx in specs]

        score = _fused_single_score(narrow, model_name=model_name,
                                    gamma=float(gamma),
                                    emb_range=float(emb_range),
                                    tb=tb_eff, vmem_limit=vmem_limit)[:b]
        reg = None
        if with_reg:
            g = dict(narrow)
            order = ['head', 'relation', 'tail']
            if model_name == 'TDistMult':
                order.append('time')
            reg = tuple(jnp.abs(g[nm][:b])[:, None, :] for nm in order)
        return score, reg

    # ---------------- batch modes ----------------
    if mode in ('head-batch', 'tail-batch'):
        if mode == 'head-batch':
            tail_part, head_part = sample
            if head_part is None or tail_part is None:
                # TODO(synk): head_part/tail_part == None (score against all
                # entities) is not implemented.
                raise NotImplementedError('None part not supported')
            pos, neg, wide_name = tail_part, head_part, 'head'
            specs = [('relation', rel_emb, pos[:, 1]),
                     ('tail', ent_emb, pos[:, 2])]
        else:
            head_part, tail_part = sample
            if head_part is None or tail_part is None:
                raise NotImplementedError('None part not supported')
            pos, neg, wide_name = head_part, tail_part, 'tail'
            specs = [('head', ent_emb, pos[:, 0]),
                     ('relation', rel_emb, pos[:, 1])]
        if temporal:
            specs.append(('time', time_emb, pos[:, 3]))

        b, n_neg = int(neg.shape[0]), int(neg.shape[1])
        d_ent = int(ent_emb.shape[1])
        tbl_bytes = ent_emb.dtype.itemsize
        want_wide_reg = with_reg
        k_inter = 5 if complexish else 3            # live f32 temporaries per elem
        narrow_term = sum(2 * int(t.shape[1]) * t.dtype.itemsize
                          + int(t.shape[1]) * 4 for _, t, _i in specs)

        # Negative-axis chunk: balanced chunks of <= 256, shrunk until the
        # minimum batch tile (8 rows) fits the VMEM budget.
        tn = _round_up(_cdiv(n_neg, max(1, _cdiv(n_neg, 256))), 8)

        def per_row(tn_):
            n_pad_ = _round_up(n_neg, tn_)
            p = (2 * tn_ * d_ent * tbl_bytes        # gather double-buffer
                 + k_inter * tn_ * d_ent * 4        # f32 broadcast intermediates
                 + narrow_term                      # narrow blocks + f32 upcasts
                 + 2 * n_pad_ * 4)                  # score output block
            if want_wide_reg:
                p += 2 * n_pad_ * d_ent * tbl_bytes  # |wide| output block
            return p

        while tn > 8 and 8 * per_row(tn) > budget:
            tn = max(8, _round_up(tn // 2, 8))
        n_pad = _round_up(n_neg, tn)
        tb_eff = _clamp_tile(budget // max(per_row(tn), 1), b, 1024, tb)
        b_pad = _round_up(b, tb_eff)

        narrow = [(nm, gather(t, _pad_idx(idx, b_pad))) for nm, t, idx in specs]
        neg_idx = jnp.pad(neg.astype(jnp.int32),
                          ((0, b_pad - b), (0, n_pad - n_neg)))

        score, wide_reg = _fused_batch_score(
            narrow, wide_name, ent_emb, neg_idx.reshape(-1),
            n_pad=n_pad, tn=tn, model_name=model_name, mode=mode,
            gamma=float(gamma), emb_range=float(emb_range),
            want_wide_reg=want_wide_reg, tb=tb_eff, vmem_limit=vmem_limit)
        score = score[:b, :n_neg]

        reg = None
        if with_reg:
            g = dict(narrow)
            order = ['head', 'relation', 'tail']
            if model_name == 'TDistMult':
                order.append('time')
            terms = []
            for nm in order:
                if nm == wide_name:
                    terms.append(wide_reg[:b, :n_neg])
                else:
                    terms.append(jnp.abs(g[nm][:b])[:, None, :])
            reg = tuple(terms)
        return score, reg

    # TODO(synk): 'rel-batch' mode is not implemented.
    raise ValueError('mode %s not supported' % mode)


# ---------------------------------------------------------------------------
# Pure-JAX reference (XLA gathers + the same math, no Pallas).
# ---------------------------------------------------------------------------
def _reference_forward(sample, ent_emb, rel_emb, time_emb, *, model_name,
                       gamma, dim, mode):
    emb_range = (gamma + EPSILON) / dim
    if mode == 'single':
        head = ent_emb[sample[:, 0]][:, None, :]
        relation = rel_emb[sample[:, 1]][:, None, :]
        tail = ent_emb[sample[:, 2]][:, None, :]
        time = time_emb[sample[:, 3]][:, None, :]
    elif mode == 'head-batch':
        tail_part, head_part = sample
        b, n = head_part.shape
        head = ent_emb[head_part.reshape(-1)].reshape(b, n, -1)
        relation = rel_emb[tail_part[:, 1]][:, None, :]
        tail = ent_emb[tail_part[:, 2]][:, None, :]
        time = time_emb[tail_part[:, 3]][:, None, :]
    else:  # tail-batch
        head_part, tail_part = sample
        b, n = tail_part.shape
        head = ent_emb[head_part[:, 0]][:, None, :]
        relation = rel_emb[head_part[:, 1]][:, None, :]
        time = time_emb[head_part[:, 3]][:, None, :]
        tail = ent_emb[tail_part.reshape(-1)].reshape(b, n, -1)

    reg = None
    if model_name in _HAS_REG:
        terms = [jnp.abs(head), jnp.abs(relation), jnp.abs(tail)]
        if model_name == 'TDistMult':
            terms.append(jnp.abs(time))
        reg = tuple(terms)

    f32 = lambda x: x.astype(jnp.float32)
    score = _score_math(model_name, mode, float(gamma), float(emb_range),
                        f32(head), f32(relation), f32(tail), f32(time),
                        keepdims=False)
    return score, reg


def _to_np_f32(x):
    return np.asarray(jnp.asarray(x, jnp.float32))


# ---------------------------------------------------------------------------
# Demo / self-test
# ---------------------------------------------------------------------------
if __name__ == "__main__":
    B, D, NEG = 16, 64, 8
    N_ENT, N_REL, N_TIME = 32, 16, 12
    GAMMA = 12.0

    key = jax.random.PRNGKey(0)
    k_ent, k_rel, k_relh, k_time, k_samp, k_neg = jax.random.split(key, 6)
    rng = (GAMMA + EPSILON) / D

    ent_emb = jax.random.uniform(k_ent, (N_ENT, D), jnp.float32, -rng, rng)
    rel_emb_full = jax.random.uniform(k_rel, (N_REL, D), jnp.float32, -rng, rng)
    # RotatE / TeRo use relation as a phase against half-dim entity chunks.
    rel_emb_half = jax.random.uniform(k_relh, (N_REL, D // 2), jnp.float32, -rng, rng)
    time_emb = jax.random.uniform(k_time, (N_TIME, D), jnp.float32, -rng, rng)

    # positive samples: columns = (head, relation, tail, time)
    pos = jnp.stack([
        jax.random.randint(jax.random.fold_in(k_samp, 0), (B,), 0, N_ENT),
        jax.random.randint(jax.random.fold_in(k_samp, 1), (B,), 0, N_REL),
        jax.random.randint(jax.random.fold_in(k_samp, 2), (B,), 0, N_ENT),
        jax.random.randint(jax.random.fold_in(k_samp, 3), (B,), 0, N_TIME),
    ], axis=1).astype(jnp.int32)
    neg_ents = jax.random.randint(k_neg, (B, NEG), 0, N_ENT).astype(jnp.int32)
    pos13, neg13 = pos[:13], neg_ents[:13]          # ragged batch
    neg5 = neg_ents[:, :5]                          # ragged negative count

    cases = [
        ('TransE',    'single',     pos,             rel_emb_full, jnp.float32),
        ('TTransE',   'single',     pos,             rel_emb_full, jnp.float32),
        ('DistMult',  'single',     pos,             rel_emb_full, jnp.float32),
        ('DistMult',  'head-batch', (pos, neg_ents), rel_emb_full, jnp.float32),
        ('DistMult',  'head-batch', (pos, neg5),     rel_emb_full, jnp.float32),
        ('TDistMult', 'tail-batch', (pos, neg_ents), rel_emb_full, jnp.float32),
        ('TransE',    'tail-batch', (pos, neg_ents), rel_emb_full, jnp.bfloat16),
        ('ComplEx',   'tail-batch', (pos, neg_ents), rel_emb_full, jnp.float32),
        ('ComplEx',   'tail-batch', (pos13, neg13),  rel_emb_full, jnp.float32),
        ('TComplEx',  'head-batch', (pos, neg_ents), rel_emb_full, jnp.float32),
        ('RotatE',    'single',     pos,             rel_emb_half, jnp.float32),
        ('RotatE',    'tail-batch', (pos, neg_ents), rel_emb_half, jnp.float32),
        ('TeRo',      'head-batch', (pos, neg_ents), rel_emb_half, jnp.float32),
    ]

    for model_name, mode, sample, rel_emb, dt in cases:
        e, r, t = ent_emb.astype(dt), rel_emb.astype(dt), time_emb.astype(dt)
        score, reg = kge_forward(sample, e, r, t, model_name=model_name,
                                 gamma=GAMMA, dim=D, mode=mode)
        score = jax.block_until_ready(score)
        ref_score, ref_reg = _reference_forward(sample, e, r, t,
                                                model_name=model_name,
                                                gamma=GAMMA, dim=D, mode=mode)
        np.testing.assert_allclose(_to_np_f32(score), _to_np_f32(ref_score),
                                   rtol=2e-5, atol=2e-5)
        if reg is None:
            assert ref_reg is None
        else:
            assert ref_reg is not None and len(reg) == len(ref_reg)
            for a, b in zip(reg, ref_reg):
                np.testing.assert_allclose(_to_np_f32(a), _to_np_f32(b),
                                           rtol=1e-6, atol=1e-6)

    print("KERNEL_OK")
</pallas_src>

<mosaic_0001>
module attributes {stable_mosaic.version = 11 : i64} {
  func.func @kernel(%arg0: i32, %arg1: memref<8x64xf32, #tpu.memory_space<vmem>>, %arg2: memref<8x64xf32, #tpu.memory_space<vmem>>, %arg3: memref<8x64xf32, #tpu.memory_space<vmem>>, %arg4: memref<8x1xf32, #tpu.memory_space<vmem>>) attributes {dimension_semantics = [#tpu.dimension_semantics<parallel>], iteration_bounds = array<i64: 2>, scalar_prefetch = 0 : i64, scratch_operands = 0 : i64, tpu.core_type = #tpu.core_type<tc>, window_params = [{transform_indices = @transform_0, window_bounds = array<i64: 8, 64>}, {transform_indices = @transform_1, window_bounds = array<i64: 8, 64>}, {transform_indices = @transform_2, window_bounds = array<i64: 8, 64>}, {transform_indices = @transform_3, window_bounds = array<i64: 8, 1>}]} {
    %c0 = arith.constant 0 : index
    %c0_0 = arith.constant 0 : index
    %0 = vector.load %arg1[%c0, %c0_0] : memref<8x64xf32, #tpu.memory_space<vmem>>, vector<8x64xf32>
    %c0_1 = arith.constant 0 : index
    %c0_2 = arith.constant 0 : index
    %1 = vector.load %arg2[%c0_1, %c0_2] : memref<8x64xf32, #tpu.memory_space<vmem>>, vector<8x64xf32>
    %c0_3 = arith.constant 0 : index
    %c0_4 = arith.constant 0 : index
    %2 = vector.load %arg3[%c0_3, %c0_4] : memref<8x64xf32, #tpu.memory_space<vmem>>, vector<8x64xf32>
    %3 = arith.addf %0, %1 : vector<8x64xf32>
    %4 = arith.subf %3, %2 : vector<8x64xf32>
    %5 = math.absf %4 : vector<8x64xf32>
    %cst = arith.constant dense<0.000000e+00> : vector<8xf32>
    %6 = vector.multi_reduction <add>, %5, %cst [1] : vector<8x64xf32> to vector<8xf32>
    %7 = vector.shape_cast %6 : vector<8xf32> to vector<8x1xf32>
    %cst_5 = arith.constant 1.200000e+01 : f32
    %8 = vector.broadcast %cst_5 : f32 to vector<8x1xf32>
    %9 = arith.subf %8, %7 : vector<8x1xf32>
    %c0_6 = arith.constant 0 : index
    %c0_7 = arith.constant 0 : index
    %10 = vector.load %arg4[%c0_6, %c0_7] : memref<8x1xf32, #tpu.memory_space<vmem>>, vector<8x1xf32>
    tpu.vector_store %arg4[%c0_6, %c0_7], %9 {strides = array<i32>} : memref<8x1xf32, #tpu.memory_space<vmem>>, vector<8x1xf32>,
    return
  }
  func.func @transform_0(%arg0: i32) -> (i32, i32) {
    %c0_i32 = arith.constant 0 : i32
    %c0_i32_0 = arith.constant 0 : i32
    return %arg0, %c0_i32 : i32, i32
  }
  func.func @transform_1(%arg0: i32) -> (i32, i32) {
    %c0_i32 = arith.constant 0 : i32
    %c0_i32_0 = arith.constant 0 : i32
    return %arg0, %c0_i32 : i32, i32
  }
  func.func @transform_2(%arg0: i32) -> (i32, i32) {
    %c0_i32 = arith.constant 0 : i32
    %c0_i32_0 = arith.constant 0 : i32
    return %arg0, %c0_i32 : i32, i32
  }
  func.func @transform_3(%arg0: i32) -> (i32, i32) {
    %c0_i32 = arith.constant 0 : i32
    %c0_i32_0 = arith.constant 0 : i32
    return %arg0, %c0_i32 : i32, i32
  }
}

</mosaic_0001>

<bundles_post_ra>
// kernel: tpu_custom_call.1
= control target key start
LH: loop header
LB: loop body
LE: loop exit
PB: predicated region body
PF: predicated region fallthrough
CT: control target
= control target key end

     0   :  { %8 = vsyncpa [#allocation3], 0  ;;  %s785_s0 = inlined_call_operand.hbm [shape: f32[16,64], index: 0, kind: input, shape index: {}]   ;;  %s786_s1 = inlined_call_operand.hbm [shape: f32[16,64], index: 1, kind: input, shape index: {}]   ;;  %s787_s2 = inlined_call_operand.hbm [shape: f32[16,64], index: 2, kind: input, shape index: {}]   ;;  %s788_s3 = inlined_call_operand.vmem [shape: f32[16,1], index: 3, kind: output, shape index: {}]  }
   0x1   :  { %10 = vsyncpa [#allocation3 + $0x1], 0 }
   0x2   :  { %11 = vsyncpa [#allocation5], 0 }
   0x3   :  { %13 = vsyncpa [#allocation5 + $0x1], 0  ;;  %s596_s12 = smov 0   ;;  %s598_s13 = smov 0  }
   0x4   :  { %s600_s14 = smov 0   ;;  %s602_s15 = smov 0  }
   0x5 LB: > { %s615_s16 = sadd.s32 4294967295, %s571_s15   ;;  %s618_s17 = sadd.s32 1, %s571_s15   ;;  %s571_s15 = sphi %s602_s15, %s803_s15   ;;  %s567_s14 = sphi %s600_s14, %s802_s14   ;;  %s563_s13 = sphi %s598_s13, %s801_s13   ;;  %s559_s12 = sphi %s596_s12, %s800_s12  }
   0x6   : > { %s23_s18 = ssub.s32 %s571_s15, %s618_s17  ;;  %s26_s19 = sadd.s32 1, %s567_s14 }
   0x7   : > { %p24_p0 = scmp.eq.s32.totalorder %s23_s18, 0  ;;  %p33_p1 = scmp.ne.s32.totalorder %s567_s14, %s563_s13 }
   0x8   : > { %p34_p2 = scmp.eq.s32.totalorder %s571_s15, 0  ;;  %p39_p3 = scmp.ne.s32.totalorder %s563_s13, %s559_s12 }
   0x9   : > { %s628_s20 = scalar_select %p24_p0, %s567_s14, %s26_s19  }
   0xa   : > { %p35_p4 = por %p34_p2, %p33_p1  ;;  %p40_p5 = scmp.eq.s32.totalorder %s615_s16, 0 }
   0xb   : > { %p410_p6 = scmp.lt.s32.totalorder %s571_s15, 2  ;;  %s141_s22 = sand.u32 1, %s567_s14  }
   0xc   : > { %p632_p7 = por %p40_p5, %p39_p3  ;;  %s639_s23 = sshll.u32 %s141_s22, 3 }
   0xd   : > { %s642_s24 = sshll.u32 %s571_s15, 7  ;;  %p644_p8 = pnand %p410_p6, %p35_p4 }
   0xe   : > { %s791_s21 = scalar_select %p632_p7, 1, 0 }
   0xf   : > { %s792_s25 = scalar_select %p644_p8, 1, 0 }
  0x10   : > { %s159_s26 = sand.u32 1, %s571_s15   ;;  %s653_s29 = scalar_lea.hbm %s786_s1, %s642_s24 }
  0x11   : > { %s163_s30 = scalar_lea.vmem [#allocation4], %s639_s23  ;;  %s660_s5 = scalar_lea.sflag [#allocation5], %s159_s26 }
  0x12   : > { %s170_s4 = sshll.u32 %s163_s30, 4  ;;  %s443_s6 = scalar_lea.hbm %s653_s29, 128  ;;  %s657_s4 = int_to_ptr.vmem [resolvable:$true] %s170_s4 }
  0x13   : > { %p444_p11 = scmp.ne.s32.totalorder %s653_s29, %s443_s6  ;;  %p666_p12 = pneg %p644_p8 }
  0x14   : > { %s448_s10 = scalar_lea.hbm %s786_s1, 256  ;;  %p449_p1 = scmp.lt.u32.totalorder %s653_s29, %s786_s1 }
  0x15   : > { %p446_p13 = pnand %p666_p12, %p444_p11  ;;  %p450_p2 = scmp.lt.u32.totalorder %s448_s10, %s443_s6 }
  0x16   : > { %p452_p4 = scmp.lt.u32.totalorder %s443_s6, %s653_s29 }
  0x17   : > { %p447_p0 = pneg %p446_p13  ;;  %p451_p3 = por %p450_p2, %p449_p1 }
  0x19   : > { %p453_p5 = por %p452_p4, %p451_p3 }
  0x1b   : > { %p454_p6 = pnand %p453_p5, %p447_p0 }
  0x1d   : > { %457 = shalt.err (!%p454_p6)
}
  0x1e   : > { %s458_s18 = scalar_lea.vmem %s657_s4, 128  ;;  %s573_s19 = smov [#allocation4]  }
  0x1f   : > { %p459_p11 = scmp.ne.s32.totalorder %s657_s4, %s458_s18  ;;  %s463_s26 = sshll.u32 %s573_s19, 4  ;;  %s464_s26 = int_to_ptr.vmem [resolvable:$false] %s463_s26 }
  0x20   : > { %s465_s27 = scalar_lea.vmem %s464_s26, 256  ;;  %p466_p10 = scmp.lt.s32.totalorder %s657_s4, %s464_s26 }
  0x21   : > { %p461_p13 = pnand %p459_p11, %p666_p12  ;;  %p467_p7 = scmp.lt.s32.totalorder %s465_s27, %s458_s18 }
  0x23   : > { %p462_p9 = pneg %p461_p13  ;;  %p468_p1 = por %p467_p7, %p466_p10 }
  0x25   : > { %p469_p2 = pnand %p468_p1, %p462_p9 }
  0x27   : > { %472 = shalt.err (!%p469_p2)
}
  0x28   : > { %406 = dma.hbm_to_vmem [thread:$0]  (!%p644_p8), %s653_s29, 128, %s657_s4, %s660_s5  }
  0x29   : > { %p794_p0 = scmp.lt.s32.totalorder %s571_s15, 3  ;;  %p795_p3 = scmp.ge.s32.totalorder %s571_s15, 1 }
  0x2a   : > { %s702_s8 = scalar_lea.hbm %s785_s0, %s642_s24  ;;  %s145_s9 = scalar_lea.vmem [#allocation2], %s639_s23 }
  0x2b   : > { %p694_p4 = pnand %p795_p3, %p794_p0  ;;  %s152_s10 = sshll.u32 %s145_s9, 4  ;;  %s705_s10 = int_to_ptr.vmem [resolvable:$true] %s152_s10 }
  0x2c   : > { %s711_s15 = scalar_lea.hbm %s787_s2, %s642_s24  ;;  %s142_s11 = scalar_lea.sflag [#allocation3], %s141_s22 }
  0x2d   : > { %s796_s28 = scalar_select %p694_p4, 1, 0 }
  0x2e   : > { %s473_s12 = scalar_lea.hbm %s702_s8, 128  ;;  %s478_s26 = scalar_lea.hbm %s785_s0, 256 }
  0x2f   : > { %p474_p7 = scmp.ne.s32.totalorder %s702_s8, %s473_s12  ;;  %p479_p5 = scmp.lt.u32.totalorder %s702_s8, %s785_s0 }
  0x30   : > { %p480_p6 = scmp.lt.u32.totalorder %s478_s26, %s473_s12  ;;  %p482_p13 = scmp.lt.u32.totalorder %s473_s12, %s702_s8 }
  0x31   : > { %p476_p9 = pnand %p474_p7, %p666_p12 }
  0x32   : > { %p481_p11 = por %p480_p6, %p479_p5 }
  0x33   : > { %p477_p10 = pneg %p476_p9 }
  0x34   : > { %p483_p1 = por %p482_p13, %p481_p11 }
  0x36   : > { %p484_p2 = pnand %p483_p1, %p477_p10 }
  0x38   : > { %487 = shalt.err (!%p484_p2)
}
  0x39   : > { %s488_s22 = scalar_lea.vmem %s705_s10, 128  ;;  %s574_s24 = smov [#allocation2]  }
  0x3a   : > { %p489_p0 = scmp.ne.s32.totalorder %s705_s10, %s488_s22  ;;  %s493_s6 = sshll.u32 %s574_s24, 4  ;;  %s494_s6 = int_to_ptr.vmem [resolvable:$false] %s493_s6 }
  0x3b   : > { %s495_s9 = scalar_lea.vmem %s494_s6, 256  ;;  %p496_p9 = scmp.lt.s32.totalorder %s705_s10, %s494_s6 }
  0x3c   : > { %p491_p3 = pnand %p489_p0, %p666_p12  ;;  %p497_p4 = scmp.lt.s32.totalorder %s495_s9, %s488_s22 }
  0x3e   : > { %p492_p7 = pneg %p491_p3  ;;  %p498_p5 = por %p497_p4, %p496_p9 }
  0x40   : > { %p499_p6 = pnand %p498_p5, %p492_p7 }
  0x42   : > { %502 = shalt.err (!%p499_p6)
}
  0x43   : > { %403 = dma.hbm_to_vmem [thread:$0]  (!%p644_p8), %s702_s8, 128, %s705_s10, %s142_s11  }
  0x44   : > { %s181_s29 = scalar_lea.vmem [#allocation6], %s639_s23  ;;  %s503_s12 = scalar_lea.hbm %s711_s15, 128 }
  0x45   : > { %s188_s4 = sshll.u32 %s181_s29, 4  ;;  %p504_p10 = scmp.ne.s32.totalorder %s711_s15, %s503_s12  ;;  %s189_s4 = int_to_ptr.vmem [resolvable:$true] %s188_s4 }
  0x46   : > { %s508_s26 = scalar_lea.hbm %s787_s2, 256  ;;  %p509_p13 = scmp.lt.u32.totalorder %s711_s15, %s787_s2 }
  0x47   : > { %p506_p4 = pnand %p504_p10, %p666_p12  ;;  %p510_p1 = scmp.lt.u32.totalorder %s508_s26, %s503_s12 }
  0x48   : > { %p512_p0 = scmp.lt.u32.totalorder %s503_s12, %s711_s15 }
  0x49   : > { %p507_p11 = pneg %p506_p4  ;;  %p511_p2 = por %p510_p1, %p509_p13 }
  0x4b   : > { %p513_p3 = por %p512_p0, %p511_p2 }
  0x4d   : > { %p514_p7 = pnand %p513_p3, %p507_p11 }
  0x4f   : > { %517 = shalt.err (!%p514_p7)
}
  0x50   : > { %s518_s23 = scalar_lea.vmem %s189_s4, 128  ;;  %s575_s8 = smov [#allocation6]  }
  0x51   : > { %p519_p9 = scmp.ne.s32.totalorder %s189_s4, %s518_s23  ;;  %s523_s10 = sshll.u32 %s575_s8, 4  ;;  %s524_s10 = int_to_ptr.vmem [resolvable:$false] %s523_s10 }
  0x52   : > { %s525_s11 = scalar_lea.vmem %s524_s10, 256  ;;  %p526_p10 = scmp.lt.s32.totalorder %s189_s4, %s524_s10 }
  0x53   : > { %p521_p5 = pnand %p519_p9, %p666_p12  ;;  %p527_p4 = scmp.lt.s32.totalorder %s525_s11, %s518_s23 }
  0x55   : > { %p522_p6 = pneg %p521_p5  ;;  %p528_p8 = por %p527_p4, %p526_p10 }
  0x57   : > { %p529_p1 = pnand %p528_p8, %p522_p6 }
  0x59   : > { %532 = shalt.err (!%p529_p1)
}
  0x5a   : > { %p797_p13 = scmp.ne.s32.totalorder %s792_s25, 0  ;;  %p798_p11 = scmp.ne.s32.totalorder %s796_s28, 0 }
  0x5b   : > { %s199_s7 = sand.u32 (!%p798_p11), 1, %s563_s13   ;;  %p799_p12 = scmp.ne.s32.totalorder (!%p798_p11), %s791_s21, 0 }
  0x5c   : > { %409 = dma.hbm_to_vmem [thread:$0]  (!%p797_p13), %s711_s15, 128, %s189_s4, %s660_s5  }
  0x5d   : > { %197 = sbr.rel (%p798_p11) target bundleno = 257 (0x101), region = 32  ;;  %s388_s22 = sshll.u32 (!%p798_p11), %s199_s7, 3 }
  0x5e   : > { %s200_s24 = scalar_lea.sflag (!%p798_p11), [#allocation3], %s199_s7  ;;  %s203_s6 = scalar_lea.vmem (!%p798_p11), [#allocation2], %s388_s22 }
  0x64   : > { %550 = dma.done.wait (%p799_p12), %s200_s24, 128  }
  0x65   : > { %552 = vsyncadd (%p799_p12), %s200_s24, 4294967168  ;;  %s208_s25 = sand.u32 1, %s615_s16   ;;  %s212_s29 = scalar_lea.vmem [#allocation4], %s388_s22 }
  0x66   : > { %s209_s9 = scalar_lea.sflag [#allocation5], %s208_s25 }
  0x67   : > { %554 = dma.done.wait (%p799_p12), %s209_s9, 256  }
  0x68   : > { %556 = vsyncadd (%p799_p12), %s209_s9, 4294967040  ;;  %v257_v0 = vld [vmem:[%s203_s6] sm:$0xff]  ;;  %v258_v1 = vld [vmem:[%s212_s29] sm:$0xff]  ;;  %s221_s5 = scalar_lea.vmem [#allocation6], %s388_s22  ;;  %vm263_vm0 = vcmask 523264   ;;  %p253_p8 = scmp.lt.s32.totalorder %s615_s16, 1 }
  0x69   : > { %v259_v2 = vld [vmem:[%s221_s5] sm:$0xff]  ;;  %v260_v3 = vadd.f32 %v258_v1, %v257_v0  ;;  %vm268_vm1 = vcmask 7168  }
  0x6a   : > { %s805_s16 = smov (!%p253_p8, %s615_s16), 1 }
  0x6b   : > { %v261_v4 = vsub.f32 %v260_v3, %v259_v2  ;;  %s391_s28 = sshll.u32 %s805_s16, 3 }
  0x6c   : > { %s256_s21 = scalar_lea.vmem %s788_s3, %s391_s28 }
  0x6d   : > { %v262_v5 = vand.u32 2147483647, %v261_v4 }
  0x6f   : > { %v264_v6 = vsel %vm263_vm0, %v262_v5, 0.0 }
  0x70   : > { %265 = vadd.xlane.f32.xlu0 %v264_v6 }
  0xfd   : > { %v266_v7 = vpop.xlane.xlu0 %265 }
  0xfe   : > { %v267_v8 = vsub.f32 12.0, %v266_v7 }
 0x100   : > { %269 = vst.msk [vmem:[%s256_s21] sm:$0xff] %vm268_vm1, %v267_v8 }
 0x101 PF: > { %p16_p2 = scmp.ge.s32.totalorder %s618_s17, 4   ;;  %s800_s12 = smov %s563_s13 }
 0x102   : > { %s801_s13 = smov %s567_s14  ;;  %s802_s14 = smov %s628_s20 }
 0x103   : > { %s803_s15 = smov %s618_s17  ;;  %18 = sbr.rel (!%p16_p2) target bundleno = 5 (0x5), region = 96 }
 0x10a   :  { %289 = vsyncpa [#allocation3], 1 }
 0x10b   :  { %291 = vsyncpa [#allocation3 + $0x1], 1 }
 0x10c   :  { %292 = vsyncpa [#allocation5], 1 }
 0x10d   :  { %294 = vsyncpa [#allocation5 + $0x1], 1 }

</bundles_post_ra>
